<compile_context>
chip_gen: v5e
topology: v5e:2x2
jax: 0.10.0
libtpu: 0.0.40
codegen_flags: <defaults>
</compile_context>

<pallas_src>
import jax
import jax.numpy as jnp
from jax.experimental import pallas as pl
from jax.experimental.pallas import tpu as pltpu

# ----------------------------- configuration --------------------------------
B = 1                 # batch (B == 1 matches the `x.size(0) == 1` predict branch)
T = 2                 # frames (sequence_length of the synthetic predictor)
C = 3                 # channels
H = W = 16
PT, PH_P, PW_P = 1, 4, 4            # predictor patch size (pt, ph, pw)
PERT = (1, 4, 4)                    # perturbation_patch_size (defaults to patch)
AGG = (1, 4, 4)                     # aggregation_patch_size  (defaults to patch)
NUM_SAMPLES = 1                     # num_samples

pH, pW = H // PH_P, W // PW_P       # mask_shape[-2:]
N = T * pH * pW                     # number of patch tokens
D = PT * PH_P * PW_P                # pixels per patch
E = D * C                           # embed dim of a patch vector
pHp, pWp = H // PERT[1], W // PERT[2]     # perturbation_mask_shape[-2:]
Pp = pHp * pWp
aH, aW = H // AGG[1], W // AGG[2]         # aggregation_mask_shape[-2:]
A = aH * aW
Da = AGG[1] * AGG[2]
K = T * C * pHp * pWp               # flattened size of the perturbation y (per batch)

IMAGENET_STD = jnp.array([0.229, 0.224, 0.225], jnp.float32)

# The structured (fused) kernel relies on the module defaults:
# perturbation_patch_size == aggregation_patch_size == predictor patch_size,
# so the perturbation/aggregation grids coincide with the predictor patch grid
# (and targets == last-frame visibility mask under set_targets(None)).
assert PERT == (PT, PH_P, PW_P) == AGG
assert (pHp, pWp) == (pH, pW) == (aH, aW)


# ----------------------------- Pallas kernel ---------------------------------
def _fused_jacobian_kernel(s_ref, base_ref, mask_ref, o_ref):
    """Analytic Jacobian of forward_mini_image, fully structured.

    s_ref    : SMEM (2,)   f32   [sum_c max(s_c,0), sum_c max(-s_c,0)]
               with s_c = (1/(Da*std_c)) * sum of the channel-c-strided rows and
               all columns of w_ch (channel-mix + imagenet normalize + agg mean
               collapsed to C scalars, then relu-sign-split to 2 scalars).
    base_ref : VMEM (1, A*Pp) f32  flattened (last-frame rows) x (frame-0 cols)
               corner of w_tok (token-mix after pred_patches_to_video /
               _postprocess_jacobian keeps only this block).
    mask_ref : VMEM (S, A*Pp) f32  0/1 last-frame visibility mask == targets,
               pre-broadcast to lane-dense layout.
    o_ref    : VMEM (S, A*Pp) f32  lane-dense Jacobian slab.

    sum_c relu(b*s_c) = relu(b)*sp + relu(-b)*sm, and relu(x)*m == relu(x*m)
    for m in {0,1}, so the whole agg_channel_func / target-select reduces to:
        xm = base * mask;  out = relu(xm)*(sp+sm) - xm*sm
    (using relu(-x) = relu(x) - x).  Scalars splat from sregs (scalar slots are
    idle here), everything else is a handful of VPU ops on two vregs.
    """
    sp = s_ref[0]
    sm = s_ref[1]
    xm = base_ref[...] * mask_ref[...]          # (S, A*Pp), lane-dense
    r = jnp.maximum(xm, 0.0)
    o_ref[...] = r * (sp + sm) - xm * sm


# ----------------------------- helpers ---------------------------------------
def upsample_masks(m, size):
    # masking.upsample_masks: nearest-neighbour upsample of the last two dims.
    fh = size[0] // m.shape[-2]
    fw = size[1] // m.shape[-1]
    return jnp.repeat(jnp.repeat(m, fh, axis=-2), fw, axis=-1)


def compute_jacobian_samples(mask_last_s, w_tok, w_ch):
    """All-sample analytic Jacobian, one un-gridded fused pallas_call.

    mask_last_s : (S, A) f32  last-frame per-patch visibility mask
                  (== targets under the asserted coincident-grid config)
    returns     : (S, A, Pp) f32  == (S, aH*aW, pHp*pWp)
    """
    # Channel-mix / imagenet-normalize / agg-mean collapsed to C scalars, then
    # relu-sign-split into 2 (tiny XLA reduce over the (E,E) weight, done once).
    row_sums = jnp.sum(w_ch, axis=1)                         # (E,)
    # E-index order from patchify '... (pt ph pw) c' is (d, c) with c fastest.
    per_ch = jnp.sum(row_sums.reshape(D, C), axis=0)         # (C,)
    s_c = per_ch / (IMAGENET_STD * float(Da))                # (C,)
    s_scalars = jnp.stack([jnp.sum(jnp.maximum(s_c, 0.0)),
                           jnp.sum(jnp.maximum(-s_c, 0.0))]) # (2,) -> SMEM

    # Token-mix: only the (last-frame rows) x (frame-0 cols) corner of w_tok
    # survives; slice + flatten lane-dense in the wrapper (no in-kernel relayout,
    # DMA scales as A*Pp instead of N^2).
    base_flat = w_tok[N - Pp:, :Pp].reshape(1, A * Pp)

    # Visibility mask (== targets), pre-broadcast to the lane-dense layout.
    mask_flat = jnp.repeat(mask_last_s, Pp, axis=-1)         # (S, A*Pp)

    out = pl.pallas_call(
        _fused_jacobian_kernel,
        out_shape=jax.ShapeDtypeStruct((NUM_SAMPLES, A * Pp), jnp.float32),
        in_specs=[
            pl.BlockSpec(memory_space=pltpu.MemorySpace.SMEM),   # (2,) scalars
            pl.BlockSpec(memory_space=pltpu.MemorySpace.VMEM),   # (1, A*Pp) base
            pl.BlockSpec(memory_space=pltpu.MemorySpace.VMEM),   # (S, A*Pp) mask
        ],
        out_specs=pl.BlockSpec(memory_space=pltpu.MemorySpace.VMEM),
    )(s_scalars, base_flat, mask_flat)
    return out.reshape(NUM_SAMPLES, A, Pp)


def jacobian_to_flows(jac):
    """_jacobian_to_flows with agg_power=None (argmax one-hot -> centroid)."""
    m = jnp.max(jac, axis=(-2, -1), keepdims=True)
    dist = (jac == m).astype(jnp.float32)                # ties -> multiple ones
    dist = dist / jnp.clip(jnp.sum(dist, axis=(-2, -1), keepdims=True), 1e-9, None)
    # TODO(synk): coordinate_ims / get_distribution_centroid are not given in the
    # reference; (row, col) unnormalized pixel-index convention is assumed.
    rows = jnp.arange(pHp, dtype=jnp.float32)
    cols = jnp.arange(pWp, dtype=jnp.float32)
    cy = jnp.sum(dist * rows[:, None], axis=(-2, -1))
    cx = jnp.sum(dist * cols[None, :], axis=(-2, -1))
    centroids = jnp.stack([cy, cx], -1)                  # (B, aH, aW, 2)
    rescale = jnp.array([aH / pHp, aW / pWp], jnp.float32)
    centroids = centroids * rescale
    gy, gx = jnp.meshgrid(jnp.arange(aH, dtype=jnp.float32),
                          jnp.arange(aW, dtype=jnp.float32), indexing="ij")
    grid = jnp.stack([gy, gx], -1)[None]                 # (1, aH, aW, 2)
    flows = jnp.transpose(centroids - grid, (0, 3, 1, 2))        # (B, 2, aH, aW)
    px_scale = jnp.array([AGG[1], AGG[2]], jnp.float32).reshape(1, 2, 1, 1)
    return flows * px_scale


# ----------------------------- forward ---------------------------------------
def derivative_flow_forward(x, mask, w_tok, w_ch):
    """DerivativeFlowGenerator.forward(x, mask, targets=None).

    x:    (B, T, C, H, W) float32
    mask: (B, N) bool, True = masked patch token.
    Returns (jacobian, flows, valid)."""
    del x  # the pipeline is affine in y; the Jacobian does not depend on x.
    mask_img = mask.reshape(B, T, pH, pW)

    # _get_mask_partition: TODO(synk): masking.partition_masks is not defined in
    # the reference; for num_samples=1 the single partition is the frame-1 mask.
    mask_list = [jnp.concatenate([mask_img[:, 0:1].reshape(B, -1),
                                  mask_img[:, 1:].reshape(B, -1)], axis=-1)]

    mask_last_s, conf_samples, valid_samples = [], [], []
    for ms in mask_list:
        ms_img = ms.reshape(B, T, pH, pW)
        # set_targets(None) -> targets == last-frame mask on the (coincident)
        # aggregation grid; identical 0/1 array, so mask and target selection are
        # merged into a single kernel input (0/1 mask is idempotent).
        mask_last_s.append(ms_img[0, T - 1].reshape(A).astype(jnp.float32))  # B == 1
        conf = jnp.ones((B, 1, aH, aW), jnp.float32)    # confidence_thresh is None
        conf_samples.append(upsample_masks(conf, (aH, aW)))
        valid_samples.append(
            upsample_masks(ms_img[:, 1:].astype(jnp.float32), (aH, aW)))

    # All samples in one fused, un-gridded Pallas call (lane-dense output).
    jac_all = compute_jacobian_samples(jnp.stack(mask_last_s, 0),
                                       w_tok, w_ch)                        # (S, A, Pp)
    jacobian = jnp.moveaxis(
        jac_all.reshape(NUM_SAMPLES, B, aH, aW, pHp, pWp), 0, -1)          # (B,aH,aW,pHp,pWp,S)

    confident = jnp.stack(conf_samples, -1)              # (B, 1, aH, aW, S)
    valid = jnp.stack(valid_samples, -1)                 # (B, T-1, aH, aW, S)
    valid = valid * confident

    # average_jacobian = True branch
    _valid = valid[:, 0][:, :, :, None, None, :]         # (B, aH, aW, 1, 1, S)
    jac_avg = jnp.sum(jacobian * _valid, -1) / jnp.clip(jnp.sum(_valid, -1), 1.0, None)
    flow_mask = (jnp.max(_valid[:, None, :, :, 0, 0, :], axis=-1) > 0).astype(jnp.float32)
    flows = jacobian_to_flows(jac_avg) * upsample_masks(flow_mask, (aH, aW))
    # targets arg is None -> no extra target masking; valid = valid * 1
    return jacobian, flows, valid


# ----------------------------- main -------------------------------------------
if __name__ == "__main__":
    key = jax.random.PRNGKey(0)
    kx, km, k1, k2 = jax.random.split(key, 4)

    x = jax.random.normal(kx, (B, T, C, H, W), jnp.float32)
    # frame 0 fully visible, frame 1 randomly masked (True = masked patch)
    m1 = jax.random.bernoulli(km, 0.5, (B, pH * pW))
    mask = jnp.concatenate([jnp.zeros((B, pH * pW), bool), m1], axis=-1)   # (B, N)

    # deterministic synthetic predictor weights (token mix + channel mix)
    w_tok = jax.random.normal(k1, (N, N), jnp.float32) / (float(N) ** 0.5)
    w_ch = jax.random.normal(k2, (E, E), jnp.float32) / (float(E) ** 0.5)

    jacobian, flows, valid = jax.jit(derivative_flow_forward)(x, mask, w_tok, w_ch)
    jax.block_until_ready((jacobian, flows, valid))
    assert jacobian.shape == (B, aH, aW, pHp, pWp, NUM_SAMPLES)
    assert flows.shape == (B, 2, aH, aW)
    assert valid.shape == (B, T - 1, aH, aW, NUM_SAMPLES)
    print("KERNEL_OK")
</pallas_src>

<mosaic_0001>
module attributes {stable_mosaic.version = 11 : i64} {
  func.func @_fused_jacobian_kernel(%arg0: memref<2xf32, #tpu.memory_space<smem>>, %arg1: memref<1x256xf32, #tpu.memory_space<vmem>>, %arg2: memref<1x256xf32, #tpu.memory_space<vmem>>, %arg3: memref<1x256xf32, #tpu.memory_space<vmem>>) attributes {dimension_semantics = [], scalar_prefetch = 0 : i64, scratch_operands = 0 : i64, tpu.core_type = #tpu.core_type<tc>} {
    %c0 = arith.constant 0 : index
    %0 = memref.load %arg0[%c0] : memref<2xf32, #tpu.memory_space<smem>>
    %c1 = arith.constant 1 : index
    %1 = memref.load %arg0[%c1] : memref<2xf32, #tpu.memory_space<smem>>
    %c0_0 = arith.constant 0 : index
    %c0_1 = arith.constant 0 : index
    %2 = vector.load %arg1[%c0_0, %c0_1] : memref<1x256xf32, #tpu.memory_space<vmem>>, vector<1x256xf32>
    %c0_2 = arith.constant 0 : index
    %c0_3 = arith.constant 0 : index
    %3 = vector.load %arg2[%c0_2, %c0_3] : memref<1x256xf32, #tpu.memory_space<vmem>>, vector<1x256xf32>
    %4 = arith.mulf %2, %3 : vector<1x256xf32>
    %cst = arith.constant 0.000000e+00 : f32
    %5 = vector.broadcast %cst : f32 to vector<1x256xf32>
    %6 = arith.maximumf %4, %5 : vector<1x256xf32>
    %7 = arith.addf %0, %1 : f32
    %8 = vector.broadcast %7 : f32 to vector<1x256xf32>
    %9 = arith.mulf %6, %8 : vector<1x256xf32>
    %10 = vector.broadcast %1 : f32 to vector<1x256xf32>
    %11 = arith.mulf %4, %10 : vector<1x256xf32>
    %12 = arith.subf %9, %11 : vector<1x256xf32>
    %c0_4 = arith.constant 0 : index
    %c0_5 = arith.constant 0 : index
    %13 = vector.load %arg3[%c0_4, %c0_5] : memref<1x256xf32, #tpu.memory_space<vmem>>, vector<1x256xf32>
    tpu.vector_store %arg3[%c0_4, %c0_5], %12 {strides = array<i32>} : memref<1x256xf32, #tpu.memory_space<vmem>>, vector<1x256xf32>,
    return
  }
}

</mosaic_0001>

<bundles_post_ra>
// kernel: derivative_flow_forward.1
= control target key start
LH: loop header
LB: loop body
LE: loop exit
PB: predicated region body
PF: predicated region fallthrough
CT: control target
= control target key end

     0   :  { %8 = vsyncpa [#allocation3], 0  ;;  %s65_s15 = smov [#allocation2]   ;;  %s98_s0 = inlined_call_operand.vmem [shape: f32[2], index: 0, kind: input, shape index: {}]   ;;  %s99_s1 = inlined_call_operand.vmem [shape: f32[1,256], index: 1, kind: input, shape index: {}]   ;;  %s100_s2 = inlined_call_operand.vmem [shape: f32[1,256], index: 2, kind: input, shape index: {}]   ;;  %s101_s3 = inlined_call_operand.vmem [shape: f32[1,256], index: 3, kind: output, shape index: {}]  }
   0x1   :  { %s14_s14 = sshll.u32 %s98_s0, 4  ;;  %s15_s14 = int_to_ptr.vmem [resolvable:$true] %s14_s14 }
   0x2   :  { %17 = dma.vmem_to_smem %s15_s14, 16, %s65_s15, [#allocation3]  }
   0x3   :  { %63 = dma.done.wait [#allocation3], 16  }
   0x4   :  { %64 = vsyncadd [#allocation3], 4294967280 }
   0x5   :  { %26 = sfence }
   0x6   :  { %s27_s16 = sld [smem:[#allocation2]]  ;;  %v29_v0 = vld [vmem:[%s99_s1] sm:$0x3]  ;;  %v39_v5 = vlaneseq }
   0x7   :  { %v30_v1 = vld [vmem:[%s100_s2] sm:$0x3]  ;;  %s49_s21 = sld [smem:[#allocation2 + $0x1]] }
   0x8   :  { %v31_v2 = vmul.f32 %v30_v1, %v29_v0  ;;  %vm41_vm0 = vcmp.lt.s32.totalorder %v39_v5, 256 }
   0xa   :  { %v32_v3 = vmax.f32 %v31_v2, 0.0 }
   0xd   :  { %s33_s22 = sadd.f32 %s49_s21, %s27_s16  ;;  %v36_v4 = vstv %s49_s21 }
   0xe   :  { %v37_v6 = vmul.f32 %v36_v4, %v31_v2 }
   0xf   :  { %v34_v7 = vstv %s33_s22 }
  0x10   :  { %v35_v8 = vmul.f32 %v34_v7, %v32_v3 }
  0x12   :  { %v38_v9 = vsub.f32 %v35_v8, %v37_v6 }
  0x14   :  { %43 = vst.msk [vmem:[%s101_s3] sm:$0x3] %vm41_vm0, %v38_v9 }
  0x15   :  { %48 = vsyncpa [#allocation3], 1 }

</bundles_post_ra>
